<compile_context>
chip_gen: v7x
topology: tpu7x:2x2x1
jax: 0.10.0
libtpu: 0.0.40
codegen_flags: <defaults>
</compile_context>

<pallas_src>
import jax
import jax.numpy as jnp
from jax.experimental import pallas as pl
from jax.experimental.pallas import tpu as pltpu


def actor_kernel(x_ref, w1_ref, b1_ref, w2_ref, b2_ref, w3_ref, b3_ref, mu_ref):
    cdt = w1_ref.dtype  # MXU input dtype (bf16 fast path or f32 exact path)

    # Layer 1: Linear + ReLU (f32 accumulation on the MXU)
    h1 = jnp.dot(x_ref[...].astype(cdt), w1_ref[...],
                 preferred_element_type=jnp.float32)
    h1 = jnp.maximum(h1 + b1_ref[...], 0.0)

    # Layer 2: Linear + ReLU
    h2 = jnp.dot(h1.astype(cdt), w2_ref[...],
                 preferred_element_type=jnp.float32)
    h2 = jnp.maximum(h2 + b2_ref[...], 0.0)

    # Layer 3: Linear + Tanh -> mu written directly at its real width A.
    mu = jnp.dot(h2.astype(cdt), w3_ref[...],
                 preferred_element_type=jnp.float32)
    mu_ref[...] = jnp.tanh(mu + b3_ref[...]).astype(mu_ref.dtype)


def _pick_tm(B, tm_cap):
    """Batch tile: multiple of 8, capped at tm_cap; keep grid >= 2 when the
    batch is large enough (v7x megacore); prefer multiples of 256 (v6e/v7x
    MXU LHS passes) once the tile is big."""
    B8 = 8 * pl.cdiv(B, 8)
    TM = min(tm_cap, B8)
    if B8 >= 512 and pl.cdiv(B, TM) < 2:
        TM = 8 * pl.cdiv(pl.cdiv(B8, 2), 8)
    if TM >= 256:
        TM = 256 * (TM // 256)
    return max(8, TM)


def actor_forward(state, params, *, tm=1024, use_bf16_mxu=True):
    """Runs the fused Actor forward. Returns (mu, std)."""
    w1, b1, w2, b2, w3, b3, log_std = params
    B, K = state.shape
    H = w1.shape[1]            # 128
    A = w3.shape[1]

    compute_dtype = jnp.bfloat16 if use_bf16_mxu else jnp.float32
    TM = _pick_tm(B, tm)
    grid = (pl.cdiv(B, TM),)

    x = state.astype(jnp.float32)
    cw1 = w1.astype(compute_dtype)
    cw2 = w2.astype(compute_dtype)
    cw3 = w3.astype(compute_dtype)
    b1r = b1.reshape(1, H).astype(jnp.float32)
    b2r = b2.reshape(1, H).astype(jnp.float32)
    b3r = b3.reshape(1, A).astype(jnp.float32)

    # Constant index_map -> block never re-fetched; stays resident in VMEM.
    resident = lambda shape: pl.BlockSpec(shape, lambda i, _s=len(shape): (0,) * _s)

    mu = pl.pallas_call(
        actor_kernel,
        out_shape=jax.ShapeDtypeStruct((B, A), jnp.float32),
        grid_spec=pltpu.PrefetchScalarGridSpec(
            num_scalar_prefetch=0,
            grid=grid,
            in_specs=[
                pl.BlockSpec((TM, K), lambda i: (i, 0)),   # x: tiled over batch
                resident((K, H)),                          # w1 (resident)
                resident((1, H)),                          # b1
                resident((H, H)),                          # w2
                resident((1, H)),                          # b2
                resident((H, A)),                          # w3
                resident((1, A)),                          # b3
            ],
            out_specs=pl.BlockSpec((TM, A), lambda i: (i, 0)),
        ),
        compiler_params=pltpu.CompilerParams(
            dimension_semantics=("parallel",),
        ),
    )(x, cw1, b1r, cw2, b2r, cw3, b3r)

    # std = exp(log_std) broadcast to mu's shape (torch expand_as). Data
    # independent of x -> computed outside the kernel.
    std = jnp.broadcast_to(jnp.exp(log_std.reshape(1, A)), mu.shape)
    return mu, std


def init_actor_params(key, state_dim, action_dim, std_init=1.0):
    """Matches init_weights: W ~ N(0, 0.1), b = 0.1, log_std = ones * std.
    Weights stored (in, out)."""
    k1, k2, k3 = jax.random.split(key, 3)
    w1 = 0.1 * jax.random.normal(k1, (state_dim, 128), dtype=jnp.float32)
    b1 = jnp.full((1, 128), 0.1, dtype=jnp.float32)
    w2 = 0.1 * jax.random.normal(k2, (128, 128), dtype=jnp.float32)
    b2 = jnp.full((1, 128), 0.1, dtype=jnp.float32)
    w3 = 0.1 * jax.random.normal(k3, (128, action_dim), dtype=jnp.float32)
    b3 = jnp.full((1, action_dim), 0.1, dtype=jnp.float32)
    log_std = jnp.full((1, action_dim), std_init, dtype=jnp.float32)
    return (w1, b1, w2, b2, w3, b3, log_std)


def actor_reference(state, params):
    w1, b1, w2, b2, w3, b3, log_std = params
    h1 = jnp.maximum(state @ w1 + b1, 0.0)
    h2 = jnp.maximum(h1 @ w2 + b2, 0.0)
    mu = jnp.tanh(h2 @ w3 + b3)
    std = jnp.broadcast_to(jnp.exp(log_std), mu.shape)
    return mu, std


if __name__ == "__main__":
    key = jax.random.PRNGKey(0)
    k_state, k_params = jax.random.split(key)

    batch = 8
    state_dim = 16
    action_dim = 8

    state = jax.random.normal(k_state, (batch, state_dim), dtype=jnp.float32)
    params = init_actor_params(k_params, state_dim, action_dim, std_init=1.0)

    mu_ref, std_ref = actor_reference(state, params)

    # Exact path (f32 MXU inputs) — bitwise-comparable to the reference.
    mu32, std32 = actor_forward(state, params, use_bf16_mxu=False)
    jax.block_until_ready((mu32, std32))
    assert mu32.shape == (batch, action_dim) and std32.shape == (batch, action_dim)
    assert jnp.allclose(mu32, mu_ref, atol=1e-5), "mu mismatch vs reference (f32 path)"
    assert jnp.allclose(std32, std_ref, atol=1e-5), "std mismatch vs reference"

    # Default fast path (bf16 MXU inputs, f32 accumulation) — tanh-bounded
    # output, loose tolerance per bf16 input rounding.
    mu, std = actor_forward(state, params)
    jax.block_until_ready((mu, std))
    assert mu.shape == (batch, action_dim) and std.shape == (batch, action_dim)
    assert jnp.allclose(mu, mu_ref, atol=3e-2), "mu mismatch vs reference (bf16 path)"
    assert jnp.allclose(std, std_ref, atol=1e-5), "std mismatch vs reference"

    print("KERNEL_OK")
</pallas_src>

<mosaic_0001>
module attributes {stable_mosaic.version = 11 : i64} {
  func.func @actor_kernel(%arg0: i32, %arg1: memref<8x16xf32, #tpu.memory_space<vmem>>, %arg2: memref<16x128xf32, #tpu.memory_space<vmem>>, %arg3: memref<1x128xf32, #tpu.memory_space<vmem>>, %arg4: memref<128x128xf32, #tpu.memory_space<vmem>>, %arg5: memref<1x128xf32, #tpu.memory_space<vmem>>, %arg6: memref<128x8xf32, #tpu.memory_space<vmem>>, %arg7: memref<1x8xf32, #tpu.memory_space<vmem>>, %arg8: memref<8x8xf32, #tpu.memory_space<vmem>>) attributes {dimension_semantics = [#tpu.dimension_semantics<parallel>], iteration_bounds = array<i64: 1>, scalar_prefetch = 0 : i64, scratch_operands = 0 : i64, tpu.core_type = #tpu.core_type<tc>, window_params = [{transform_indices = @transform_0, window_bounds = array<i64: 8, 16>}, {pipeline_mode = #tpu.pipeline_mode<synchronous>, transform_indices = @transform_1, window_bounds = array<i64: 16, 128>}, {pipeline_mode = #tpu.pipeline_mode<synchronous>, transform_indices = @transform_2, window_bounds = array<i64: 1, 128>}, {pipeline_mode = #tpu.pipeline_mode<synchronous>, transform_indices = @transform_3, window_bounds = array<i64: 128, 128>}, {pipeline_mode = #tpu.pipeline_mode<synchronous>, transform_indices = @transform_4, window_bounds = array<i64: 1, 128>}, {pipeline_mode = #tpu.pipeline_mode<synchronous>, transform_indices = @transform_5, window_bounds = array<i64: 128, 8>}, {pipeline_mode = #tpu.pipeline_mode<synchronous>, transform_indices = @transform_6, window_bounds = array<i64: 1, 8>}, {transform_indices = @transform_7, window_bounds = array<i64: 8, 8>}]} {
    %c0 = arith.constant 0 : index
    %c0_0 = arith.constant 0 : index
    %0 = vector.load %arg1[%c0, %c0_0] : memref<8x16xf32, #tpu.memory_space<vmem>>, vector<8x16xf32>
    %c0_1 = arith.constant 0 : index
    %c0_2 = arith.constant 0 : index
    %1 = vector.load %arg2[%c0_1, %c0_2] : memref<16x128xf32, #tpu.memory_space<vmem>>, vector<16x128xf32>
    %cst = arith.constant dense<0.000000e+00> : vector<8x128xf32>
    %2 = tpu.matmul %0, %1, %cst {dimension_numbers = #tpu.dot_dimension_numbers<[1], [0], [0], [1], [0, 0, 1, 1], [], []>} : vector<8x16xf32>, vector<16x128xf32>, vector<8x128xf32> -> vector<8x128xf32>
    %c0_3 = arith.constant 0 : index
    %c0_4 = arith.constant 0 : index
    %3 = vector.load %arg3[%c0_3, %c0_4] : memref<1x128xf32, #tpu.memory_space<vmem>>, vector<1x128xf32>
    %4 = vector.broadcast %3 : vector<1x128xf32> to vector<8x128xf32>
    %5 = arith.addf %2, %4 : vector<8x128xf32>
    %cst_5 = arith.constant 0.000000e+00 : f32
    %6 = vector.broadcast %cst_5 : f32 to vector<8x128xf32>
    %7 = arith.maximumf %5, %6 : vector<8x128xf32>
    %c0_6 = arith.constant 0 : index
    %c0_7 = arith.constant 0 : index
    %8 = vector.load %arg4[%c0_6, %c0_7] : memref<128x128xf32, #tpu.memory_space<vmem>>, vector<128x128xf32>
    %cst_8 = arith.constant dense<0.000000e+00> : vector<8x128xf32>
    %9 = tpu.matmul %7, %8, %cst_8 {dimension_numbers = #tpu.dot_dimension_numbers<[1], [0], [0], [1], [0, 0, 1, 1], [], []>} : vector<8x128xf32>, vector<128x128xf32>, vector<8x128xf32> -> vector<8x128xf32>
    %c0_9 = arith.constant 0 : index
    %c0_10 = arith.constant 0 : index
    %10 = vector.load %arg5[%c0_9, %c0_10] : memref<1x128xf32, #tpu.memory_space<vmem>>, vector<1x128xf32>
    %11 = vector.broadcast %10 : vector<1x128xf32> to vector<8x128xf32>
    %12 = arith.addf %9, %11 : vector<8x128xf32>
    %cst_11 = arith.constant 0.000000e+00 : f32
    %13 = vector.broadcast %cst_11 : f32 to vector<8x128xf32>
    %14 = arith.maximumf %12, %13 : vector<8x128xf32>
    %c0_12 = arith.constant 0 : index
    %c0_13 = arith.constant 0 : index
    %15 = vector.load %arg6[%c0_12, %c0_13] : memref<128x8xf32, #tpu.memory_space<vmem>>, vector<128x8xf32>
    %cst_14 = arith.constant dense<0.000000e+00> : vector<8x8xf32>
    %16 = tpu.matmul %14, %15, %cst_14 {dimension_numbers = #tpu.dot_dimension_numbers<[1], [0], [0], [1], [0, 0, 1, 1], [], []>} : vector<8x128xf32>, vector<128x8xf32>, vector<8x8xf32> -> vector<8x8xf32>
    %c0_15 = arith.constant 0 : index
    %c0_16 = arith.constant 0 : index
    %17 = vector.load %arg7[%c0_15, %c0_16] : memref<1x8xf32, #tpu.memory_space<vmem>>, vector<1x8xf32>
    %18 = vector.broadcast %17 : vector<1x8xf32> to vector<8x8xf32>
    %19 = arith.addf %16, %18 : vector<8x8xf32>
    %20 = math.tanh %19 : vector<8x8xf32>
    %c0_17 = arith.constant 0 : index
    %c0_18 = arith.constant 0 : index
    %21 = vector.load %arg8[%c0_17, %c0_18] : memref<8x8xf32, #tpu.memory_space<vmem>>, vector<8x8xf32>
    tpu.vector_store %arg8[%c0_17, %c0_18], %20 {strides = array<i32>} : memref<8x8xf32, #tpu.memory_space<vmem>>, vector<8x8xf32>,
    return
  }
  func.func @transform_0(%arg0: i32) -> (i32, i32) {
    %c0_i32 = arith.constant 0 : i32
    %c0_i32_0 = arith.constant 0 : i32
    return %arg0, %c0_i32 : i32, i32
  }
  func.func @transform_1(%arg0: i32) -> (i32, i32) {
    %c0_i32 = arith.constant 0 : i32
    %c0_i32_0 = arith.constant 0 : i32
    %c0_i32_1 = arith.constant 0 : i32
    return %c0_i32, %c0_i32_0 : i32, i32
  }
  func.func @transform_2(%arg0: i32) -> (i32, i32) {
    %c0_i32 = arith.constant 0 : i32
    %c0_i32_0 = arith.constant 0 : i32
    %c0_i32_1 = arith.constant 0 : i32
    return %c0_i32, %c0_i32_0 : i32, i32
  }
  func.func @transform_3(%arg0: i32) -> (i32, i32) {
    %c0_i32 = arith.constant 0 : i32
    %c0_i32_0 = arith.constant 0 : i32
    %c0_i32_1 = arith.constant 0 : i32
    return %c0_i32, %c0_i32_0 : i32, i32
  }
  func.func @transform_4(%arg0: i32) -> (i32, i32) {
    %c0_i32 = arith.constant 0 : i32
    %c0_i32_0 = arith.constant 0 : i32
    %c0_i32_1 = arith.constant 0 : i32
    return %c0_i32, %c0_i32_0 : i32, i32
  }
  func.func @transform_5(%arg0: i32) -> (i32, i32) {
    %c0_i32 = arith.constant 0 : i32
    %c0_i32_0 = arith.constant 0 : i32
    %c0_i32_1 = arith.constant 0 : i32
    return %c0_i32, %c0_i32_0 : i32, i32
  }
  func.func @transform_6(%arg0: i32) -> (i32, i32) {
    %c0_i32 = arith.constant 0 : i32
    %c0_i32_0 = arith.constant 0 : i32
    %c0_i32_1 = arith.constant 0 : i32
    return %c0_i32, %c0_i32_0 : i32, i32
  }
  func.func @transform_7(%arg0: i32) -> (i32, i32) {
    %c0_i32 = arith.constant 0 : i32
    %c0_i32_0 = arith.constant 0 : i32
    return %arg0, %c0_i32 : i32, i32
  }
}

</mosaic_0001>

<bundles_post_ra>
// kernel: tpu_custom_call.1
= control target key start
LH: loop header
LB: loop body
LE: loop exit
PB: predicated region body
PF: predicated region fallthrough
CT: control target
= control target key end

     0   :  { %12 = vsyncpa [#allocation3], 0  ;;  %s753_s0 = inlined_call_operand.hbm [shape: f32[8,16], index: 0, kind: input, shape index: {}]   ;;  %s754_s1 = inlined_call_operand.vmem [shape: f32[16,128], index: 1, kind: input, shape index: {}]   ;;  %s755_s2 = inlined_call_operand.vmem [shape: f32[1,128], index: 2, kind: input, shape index: {}]   ;;  %s756_s3 = inlined_call_operand.vmem [shape: f32[128,128], index: 3, kind: input, shape index: {}]   ;;  %s757_s4 = inlined_call_operand.vmem [shape: f32[1,128], index: 4, kind: input, shape index: {}]   ;;  %s758_s5 = inlined_call_operand.vmem [shape: f32[128,8], index: 5, kind: input, shape index: {}]   ;;  %s759_s6 = inlined_call_operand.vmem [shape: f32[1,8], index: 6, kind: input, shape index: {}]   ;;  %s760_s7 = inlined_call_operand.hbm [shape: f32[8,8], index: 7, kind: output, shape index: {}]  }
   0x1   :  { %13 = vsyncpa [#allocation4], 0  ;;  %s553_s24 = smov [#allocation2]   ;;  %s505_s28 = scalar_lea.hbm %s753_s0, 128 }
   0x2   :  { %s20_s25 = sshll.u32 %s553_s24, 4  ;;  %p506_p0 = scmp.ne.s32.totalorder %s753_s0, %s505_s28  ;;  %s21_s25 = int_to_ptr.vmem [resolvable:$true] %s20_s25 }
   0x3   :  { %p509_p1 = scmp.lt.u32.totalorder %s505_s28, %s753_s0 }
   0x5   :  { %p511_p2 = pnand %p509_p1, %p506_p0 }
   0x7   :  { %514 = shalt.err (!%p511_p2)
}
   0x8   :  { %s515_s10 = scalar_lea.vmem %s21_s25, 128  ;;  %p520_p4 = scmp.lt.s32.totalorder %s21_s25, %s21_s25 }
   0x9   :  { %p516_p3 = scmp.ne.s32.totalorder %s21_s25, %s515_s10  ;;  %p521_p5 = scmp.lt.s32.totalorder %s515_s10, %s515_s10 }
   0xb   :  { %p522_p6 = por %p521_p5, %p520_p4 }
   0xd   :  { %p523_p7 = pnand %p522_p6, %p516_p3 }
   0xf   :  { %526 = shalt.err (!%p523_p7)
}
  0x10   :  { %23 = dma.hbm_to_vmem [thread:$0]  %s753_s0, 128, %s21_s25, [#allocation3]  }
  0x11   :  { %549 = dma.done.wait [#allocation3], 128  }
  0x12   :  { %550 = vsyncadd [#allocation3], 4294967168  ;;  %v554_v0 = vmov 0.0|0.0   ;;  %vm555_vm0 = vmmov 0   ;;  %v556_v1 = vmov 0.0   ;;  %v40_v2 = vld [vmem:[%s754_s1] sm:$0xff] }
  0x13   :  { %447 = vmatprep.subr.bf16.mxu0 %v554_v0  ;;  %374 = vmatprep.mubr.msk.f32.mxu0 %vm555_vm0, %v556_v1  ;;  %v41_v3 = vld [vmem:[%s754_s1 + $0x8] sm:$0xff]  ;;  %v124_v5 = vld [vmem:[%s756_s3] sm:$0xff]  ;;  %v126_v7 = vld [vmem:[%s756_s3 + $0x10] sm:$0xff]  ;;  %vm49_vm1 = vcmask 130048   ;;  %vm312_vm2 = vcmask 64512  }
  0x14   :  { %450 = vmatprep.subr.bf16.mxu1 %v554_v0  ;;  %409 = vmatprep.mubr.msk.f32.mxu1 %vm555_vm0, %v556_v1  ;;  %v448_v4 = vpack.c.bf16 %v41_v3, %v40_v2  ;;  %v125_v6 = vld [vmem:[%s756_s3 + $0x8] sm:$0xff]  ;;  %v127_v9 = vld [vmem:[%s756_s3 + $0x18] sm:$0xff]  ;;  %v39_v10 = vld [vmem:[#allocation2] sm:$0xff] }
  0x15   :  { %v451_v8 = vpack.c.bf16 %v125_v6, %v124_v5  ;;  %v454_v11 = vpack.c.bf16 %v127_v9, %v126_v7  ;;  %v128_v12 = vld [vmem:[%s756_s3 + $0x20] sm:$0xff]  ;;  %v129_v13 = vld [vmem:[%s756_s3 + $0x28] sm:$0xff]  ;;  %v130_v15 = vld [vmem:[%s756_s3 + $0x30] sm:$0xff] }
  0x16   :  { %449 = vmatpush3.bf16.msra.mxu0 %v448_v4  ;;  %v457_v14 = vpack.c.bf16 %v129_v13, %v128_v12  ;;  %v131_v16 = vld [vmem:[%s756_s3 + $0x38] sm:$0xff]  ;;  %v132_v18 = vld [vmem:[%s756_s3 + $0x40] sm:$0xff]  ;;  %v133_v19 = vld [vmem:[%s756_s3 + $0x48] sm:$0xff] }
  0x17   :  { %452 = vmatpush3.bf16.msra.mxu1 %v451_v8  ;;  %474 = vmatprep.subr.bf16.mxu0 %v554_v0  ;;  %v460_v17 = vpack.c.bf16 %v131_v16, %v130_v15  ;;  %v463_v20 = vpack.c.bf16 %v133_v19, %v132_v18  ;;  %v134_v21 = vld [vmem:[%s756_s3 + $0x50] sm:$0xff]  ;;  %v135_v22 = vld [vmem:[%s756_s3 + $0x58] sm:$0xff]  ;;  %v136_v24 = vld [vmem:[%s756_s3 + $0x60] sm:$0xff] }
  0x18   :  { %453 = vmatprep.subr.bf16.mxu1 %v554_v0  ;;  %v466_v23 = vpack.c.bf16 %v135_v22, %v134_v21  ;;  %v137_v25 = vld [vmem:[%s756_s3 + $0x68] sm:$0xff]  ;;  %v138_v27 = vld [vmem:[%s756_s3 + $0x70] sm:$0xff]  ;;  %v139_v28 = vld [vmem:[%s756_s3 + $0x78] sm:$0xff] }
  0x19   :  { %375 = vmatmul.mubr.msk.f32.vlgmr.msra.gmra.mrb[0].mxu0 %vm49_vm1, %v39_v10  ;;  %v469_v26 = vpack.c.bf16 %v137_v25, %v136_v24  ;;  %v472_v29 = vpack.c.bf16 %v139_v28, %v138_v27  ;;  %v218_v30 = vld [vmem:[%s758_s5] sm:$0xff]  ;;  %v219_v31 = vld [vmem:[%s758_s5 + $0x8] sm:$0xff]  ;;  %v220_v32 = vld [vmem:[%s758_s5 + $0x10] sm:$0xff] }
  0x1a   :  { %444 = vmatprep.mubr.msk.f32.mxu0 %vm555_vm0, %v556_v1  ;;  %v475_v33 = vpack.c.bf16 %v219_v31, %v218_v30  ;;  %v221_v34 = vld [vmem:[%s758_s5 + $0x18] sm:$0xff]  ;;  %v222_v36 = vld [vmem:[%s758_s5 + $0x20] sm:$0xff]  ;;  %v223_v37 = vld [vmem:[%s758_s5 + $0x28] sm:$0xff] }
  0x1b   :  { %455 = vmatpush3.bf16.msra.mxu1 %v454_v11  ;;  %v478_v35 = vpack.c.bf16 %v221_v34, %v220_v32  ;;  %v481_v38 = vpack.c.bf16 %v223_v37, %v222_v36  ;;  %v224_v39 = vld [vmem:[%s758_s5 + $0x30] sm:$0xff]  ;;  %v225_v40 = vld [vmem:[%s758_s5 + $0x38] sm:$0xff]  ;;  %v226_v42 = vld [vmem:[%s758_s5 + $0x40] sm:$0xff] }
  0x1c   :  { %456 = vmatprep.subr.bf16.mxu1 %v554_v0  ;;  %476 = vmatpush3.bf16.msra.mxu0 %v475_v33  ;;  %v484_v41 = vpack.c.bf16 %v225_v40, %v224_v39  ;;  %v227_v43 = vld [vmem:[%s758_s5 + $0x48] sm:$0xff]  ;;  %v228_v45 = vld [vmem:[%s758_s5 + $0x50] sm:$0xff]  ;;  %v229_v46 = vld [vmem:[%s758_s5 + $0x58] sm:$0xff] }
  0x1d   :  { %477 = vmatprep.subr.bf16.mxu0 %v554_v0  ;;  %v487_v44 = vpack.c.bf16 %v227_v43, %v226_v42  ;;  %v490_v47 = vpack.c.bf16 %v229_v46, %v228_v45  ;;  %v230_v48 = vld [vmem:[%s758_s5 + $0x60] sm:$0xff]  ;;  %v231_v49 = vld [vmem:[%s758_s5 + $0x68] sm:$0xff]  ;;  %v232_v56 = vld [vmem:[%s758_s5 + $0x70] sm:$0xff] }
  0x1e   :  { %v493_v50 = vpack.c.bf16 %v231_v49, %v230_v48  ;;  %v329_v51 = vld [vmem:[%s755_s2] ss:$0 sm:$0xff]  ;;  %v233_v57 = vld [vmem:[%s758_s5 + $0x78] sm:$0xff]  ;;  %s557_s5 = smov [#allocation5]  }
  0x1f   :  { %458 = vmatpush3.bf16.msra.mxu1 %v457_v14  ;;  %v496_v58 = vpack.c.bf16 %v233_v57, %v232_v56  ;;  %v331_v59 = vld [vmem:[%s757_s4] ss:$0 sm:$0xff]  ;;  %s320_s9 = sshll.u32 %s557_s5, 4  ;;  %s321_s9 = int_to_ptr.vmem [resolvable:$true] %s320_s9 }
  0x20   :  { %459 = vmatprep.subr.bf16.mxu1 %v554_v0  ;;  %479 = vmatpush3.bf16.msra.mxu0 %v478_v35  ;;  %s527_s4 = scalar_lea.vmem %s321_s9, 128  ;;  %p532_p9 = scmp.lt.s32.totalorder %s321_s9, %s321_s9 }
  0x21   :  { %480 = vmatprep.subr.bf16.mxu0 %v554_v0  ;;  %p528_p8 = scmp.ne.s32.totalorder %s321_s9, %s527_s4  ;;  %p533_p10 = scmp.lt.s32.totalorder %s527_s4, %s527_s4 }
  0x23   :  { %461 = vmatpush3.bf16.msra.mxu1 %v460_v17  ;;  %p534_p11 = por %p533_p10, %p532_p9 }
  0x24   :  { %462 = vmatprep.subr.bf16.mxu1 %v554_v0  ;;  %482 = vmatpush3.bf16.msra.mxu0 %v481_v38 }
  0x25   :  { %483 = vmatprep.subr.bf16.mxu0 %v554_v0  ;;  %p535_p12 = pnand %p534_p11, %p528_p8 }
  0x27   :  { %464 = vmatpush3.bf16.msra.mxu1 %v463_v20 }
  0x28   :  { %465 = vmatprep.subr.bf16.mxu1 %v554_v0  ;;  %485 = vmatpush3.bf16.msra.mxu0 %v484_v41 }
  0x29   :  { %486 = vmatprep.subr.bf16.mxu0 %v554_v0 }
  0x2b   :  { %467 = vmatpush3.bf16.msra.mxu1 %v466_v23 }
  0x2c   :  { %468 = vmatprep.subr.bf16.mxu1 %v554_v0  ;;  %488 = vmatpush3.bf16.msra.mxu0 %v487_v44 }
  0x2d   :  { %489 = vmatprep.subr.bf16.mxu0 %v554_v0 }
  0x2f   :  { %470 = vmatpush3.bf16.msra.mxu1 %v469_v26 }
  0x30   :  { %471 = vmatprep.subr.bf16.mxu1 %v554_v0  ;;  %491 = vmatpush3.bf16.msra.mxu0 %v490_v47 }
  0x31   :  { %492 = vmatprep.subr.bf16.mxu0 %v554_v0 }
  0x33   :  { %473 = vmatpush3.bf16.msra.mxu1 %v472_v29 }
  0x34   :  { %494 = vmatpush3.bf16.msra.mxu0 %v493_v50 }
  0x35   :  { %495 = vmatprep.subr.bf16.mxu0 %v554_v0  ;;  %v332_v0 = vld [vmem:[%s759_s6] ss:$0 sm:$0xff] }
  0x38   :  { %497 = vmatpush3.bf16.msra.mxu0 %v496_v58 }
  0xec   :  { %v119_v52 = vpop.f32.mrb[0].mxu0 }
  0xed   :  { %v120_v53 = vadd.f32 %v329_v51, %v119_v52  ;;  %v376_v54 = vpop.f32.mrb[1].mxu0 }
  0xef   :  { %v123_v55 = vmax.f32 %v120_v53, 0.0 }
  0xf1   :  { %410 = vmatmul.mubr.f32.vlgmr.msra.gmra.mrb[0].mxu1 %v123_v55 }
 0x1c4   :  { %v213_v60 = vpop.f32.mrb[0].mxu1 }
 0x1c5   :  { %v214_v61 = vadd.f32 %v331_v59, %v213_v60  ;;  %v411_v62 = vpop.f32.mrb[1].mxu1 }
 0x1c7   :  { %v217_v63 = vmax.f32 %v214_v61, 0.0 }
 0x1c9   :  { %445 = vmatmul.mubr.f32.vlgmr.msra.gmra.mrb[2].mxu0 %v217_v63 }
 0x29c   :  { %v307_v1 = vpop.f32.mrb[2].mxu0 }
 0x29d   :  { %v308_v2 = vadd.f32 %v332_v0, %v307_v1  ;;  %v446_v3 = vpop.f32.mrb[3].mxu0 }
 0x29f   :  { %503 = vtanh.f32 %v308_v2 }
 0x2a9   :  { %v504_v4 = vpop.eup %503 }
 0x2aa   :  { %313 = vst.msk [vmem:[#allocation5] sm:$0xff] %vm312_vm2, %v504_v4 }
 0x2ab   :  { %538 = shalt.err (!%p535_p12)
}
 0x2ac   :  { %s539_s6 = scalar_lea.hbm %s760_s7, 128 }
 0x2ad   :  { %p540_p13 = scmp.ne.s32.totalorder %s760_s7, %s539_s6  ;;  %p543_p0 = scmp.lt.u32.totalorder %s539_s6, %s760_s7 }
 0x2af   :  { %p545_p1 = pnand %p543_p0, %p540_p13 }
 0x2b1   :  { %548 = shalt.err (!%p545_p1)
}
 0x2b2   :  { %323 = dma.vmem_to_hbm [thread:$0]  %s321_s9, 128, %s760_s7, [#allocation4]  }
 0x2b3   :  { %551 = dma.done.wait [#allocation4], 128  }
 0x2b4   :  { %552 = vsyncadd [#allocation4], 4294967168 }
 0x2b5   :  { %327 = vsyncpa [#allocation3], 1 }
 0x2b6   :  { %328 = vsyncpa [#allocation4], 1 }

</bundles_post_ra>
